<compile_context>
chip_gen: v7x
topology: tpu7x:2x2x1
jax: 0.10.0
libtpu: 0.0.40
codegen_flags: <defaults>
</compile_context>

<pallas_src>
import functools

import jax
import jax.numpy as jnp
from jax.experimental import pallas as pl
from jax.experimental.pallas import tpu as pltpu

LEAKY_SLOPE = 0.01
BN_EPS = 1e-5
HIDDEN = 512
HEAD_PAD = 128          # fused [A | V | 0-pad] head width -> lane-dense output
N_COL_STEPS = 4         # grid steps over fc2/head feature columns (2-4 per review)
COL_TILE = HIDDEN // N_COL_STEPS


def _round_up(x, m):
    return ((x + m - 1) // m) * m


def _ddqn_kernel(apply_bn,
                 x_ref, w1_ref, g1_ref, beta1_ref,
                 w2_ref, b2_ref, g2_ref, beta2_ref,
                 wh_ref, bh_ref,
                 out_ref, h1_ref):
    k = pl.program_id(0)

    def leaky(h):
        # max(h, 0.01*h) == leaky_relu(h, 0.01); mul+max instead of cmp+select.
        return jnp.maximum(h, LEAKY_SLOPE * h)

    def batchnorm(h, g, b):
        # training-mode BatchNorm1d with full-batch, two-pass (centered) stats in f32.
        mean = jnp.mean(h, axis=0, keepdims=True)
        c = h - mean
        var = jnp.mean(c * c, axis=0, keepdims=True)
        return c * jax.lax.rsqrt(var + BN_EPS) * g + b

    @pl.when(k == 0)
    def _():
        # fc1 (bias folded into w1 via the appended ones column of x)
        h1 = jnp.dot(x_ref[...], w1_ref[...], preferred_element_type=jnp.float32)
        h1 = leaky(h1)
        # TODO(synk): nn.Dropout(p=0.2) is stochastic in training mode; applied as
        # eval-mode identity here.
        if apply_bn:
            h1 = batchnorm(h1, g1_ref[...], beta1_ref[...])
        h1_ref[...] = h1.astype(jnp.bfloat16)          # bf16 MXU operand for fc2
        out_ref[...] = jnp.broadcast_to(bh_ref[...], out_ref.shape)  # init with head bias

    # Per-step 128-feature slice of fc2 -> leaky -> dropout(id) -> bn2, then the
    # matching 128 rows of the fused [A | V | pad] head accumulate into out_ref.
    h2 = jnp.dot(h1_ref[...], w2_ref[...],
                 preferred_element_type=jnp.float32) + b2_ref[...]
    h2 = leaky(h2)
    if apply_bn:
        h2 = batchnorm(h2, g2_ref[...], beta2_ref[...])
    out_ref[...] += jnp.dot(h2.astype(jnp.bfloat16), wh_ref[...],
                            preferred_element_type=jnp.float32)


def pack_params(params, d_in):
    """Host-side packing: bf16 weights, b1 folded into w1, fused lane-padded [A|V] head."""
    n_actions = params["wa"].shape[1]
    assert n_actions + 1 <= HEAD_PAD, "fused head assumes n_actions + 1 <= 128"
    k1p = max(128, _round_up(d_in + 1, 128))
    # Rows of w1p: [w1 ; b1 ; zero-pad] -- the ones column appended to x picks up b1.
    w1p = jnp.concatenate(
        [params["w1"], params["b1"],
         jnp.zeros((k1p - d_in - 1, HIDDEN), jnp.float32)], axis=0)
    pad = HEAD_PAD - n_actions - 1
    wh = jnp.concatenate(
        [params["wa"], params["wv"], jnp.zeros((HIDDEN, pad), jnp.float32)], axis=1)
    bh = jnp.concatenate(
        [params["ba"], params["bv"], jnp.zeros((1, pad), jnp.float32)], axis=1)
    return dict(
        k1p=k1p,
        w1=w1p.astype(jnp.bfloat16),
        g1=params["g1"], beta1=params["beta1"],
        w2=params["w2"].astype(jnp.bfloat16), b2=params["b2"],
        g2=params["g2"], beta2=params["beta2"],
        wh=wh.astype(jnp.bfloat16), bh=bh)


def _pad_state(state, k1p):
    """Pad state to lane-aligned k1p columns with an appended ones column (bias fold)."""
    B, d_in = state.shape
    ones = jnp.ones((B, 1), state.dtype)
    zpad = jnp.zeros((B, k1p - d_in - 1), state.dtype)
    return jnp.concatenate([state, ones, zpad], axis=1).astype(jnp.bfloat16)


def _vmem_limit_bytes(needed):
    """Generation-aware scoped-VMEM request: <= 3/8 of physical VMEM, >= 16 MiB."""
    try:
        cap = int(pltpu.get_tpu_info().vmem_capacity_bytes)
    except Exception:  # pragma: no cover - conservative fallback (v5e/v6e size)
        cap = 128 << 20
    return int(min(max(2 * needed, 16 << 20), (3 * cap) // 8))


def ddqn_forward(state, packed, n_actions):
    B, d_in = state.shape
    k1p = packed["k1p"]
    apply_bn = B > 1  # matches `if flat.size(0) > 1` -- static at trace time

    xp = _pad_state(state, k1p)
    args = (xp,
            packed["w1"], packed["g1"], packed["beta1"],
            packed["w2"], packed["b2"], packed["g2"], packed["beta2"],
            packed["wh"], packed["bh"])

    in_specs = [
        pl.BlockSpec((B, k1p), lambda k: (0, 0)),            # x (padded, ones col)
        pl.BlockSpec((k1p, HIDDEN), lambda k: (0, 0)),        # w1 (+ folded b1 row)
        pl.BlockSpec((1, HIDDEN), lambda k: (0, 0)),          # bn1 gamma
        pl.BlockSpec((1, HIDDEN), lambda k: (0, 0)),          # bn1 beta
        pl.BlockSpec((HIDDEN, COL_TILE), lambda k: (0, k)),   # w2 column tile (streamed)
        pl.BlockSpec((1, COL_TILE), lambda k: (0, k)),        # b2 slice
        pl.BlockSpec((1, COL_TILE), lambda k: (0, k)),        # bn2 gamma slice
        pl.BlockSpec((1, COL_TILE), lambda k: (0, k)),        # bn2 beta slice
        pl.BlockSpec((COL_TILE, HEAD_PAD), lambda k: (k, 0)), # fused head row tile
        pl.BlockSpec((1, HEAD_PAD), lambda k: (0, 0)),        # fused head bias
    ]
    out_spec = pl.BlockSpec((B, HEAD_PAD), lambda k: (0, 0))  # resident accumulator

    # advisory cost hint so XLA schedules neighbouring ops around this tiny kernel
    in_bytes = sum(int(a.size) * a.dtype.itemsize for a in args)
    out_bytes = B * HEAD_PAD * 4
    flops = 2 * B * (k1p * HIDDEN + HIDDEN * HIDDEN + HIDDEN * HEAD_PAD)
    cost = pl.CostEstimate(flops=flops,
                           transcendentals=(2 * HIDDEN if apply_bn else 0),
                           bytes_accessed=in_bytes + out_bytes)

    # VMEM budget: resident inputs + double-buffered streamed tiles + scratch + temps.
    tile_bytes = HIDDEN * COL_TILE * 2 + COL_TILE * HEAD_PAD * 2 + 3 * COL_TILE * 4
    needed = (in_bytes + out_bytes + 2 * tile_bytes
              + B * HIDDEN * 2          # bf16 h1 scratch
              + 2 * B * HIDDEN * 4)     # f32 h1/h2 live intermediates
    vmem_limit = _vmem_limit_bytes(needed)

    grid_spec = pltpu.PrefetchScalarGridSpec(
        num_scalar_prefetch=0,
        grid=(N_COL_STEPS,),
        in_specs=in_specs,
        out_specs=out_spec,
        scratch_shapes=[pltpu.VMEM((B, HIDDEN), jnp.bfloat16)],
    )

    out = pl.pallas_call(
        functools.partial(_ddqn_kernel, apply_bn),
        out_shape=jax.ShapeDtypeStruct((B, HEAD_PAD), jnp.float32),
        grid_spec=grid_spec,
        compiler_params=pltpu.CompilerParams(
            dimension_semantics=("arbitrary",),   # head accumulates across column steps
            vmem_limit_bytes=vmem_limit),
        cost_estimate=cost,
    )(*args)

    V = out[:, n_actions:n_actions + 1]
    A = out[:, :n_actions]
    return V, A


def init_params(key, d_in, n_actions, hidden=HIDDEN):
    """Deterministic init mimicking PyTorch's default Linear init (U[-1/sqrt(fan_in), +])."""
    def linear(k, fan_in, fan_out):
        kw, kb = jax.random.split(k)
        bound = 1.0 / jnp.sqrt(jnp.float32(fan_in))
        w = jax.random.uniform(kw, (fan_in, fan_out), jnp.float32, -bound, bound)
        b = jax.random.uniform(kb, (1, fan_out), jnp.float32, -bound, bound)
        return w, b

    k1, k2, k3, k4 = jax.random.split(key, 4)
    w1, b1 = linear(k1, d_in, hidden)
    w2, b2 = linear(k2, hidden, hidden)
    wv, bv = linear(k3, hidden, 1)
    wa, ba = linear(k4, hidden, n_actions)
    ones = jnp.ones((1, hidden), jnp.float32)
    zeros = jnp.zeros((1, hidden), jnp.float32)
    return dict(w1=w1, b1=b1, g1=ones, beta1=zeros,
                w2=w2, b2=b2, g2=ones, beta2=zeros,
                wv=wv, bv=bv, wa=wa, ba=ba)


def ddqn_reference(state, params):
    """Pure-JAX reference with the same bf16-operand / f32-accumulate quantization."""
    def leaky(h):
        return jnp.maximum(h, LEAKY_SLOPE * h)

    def bn(h, g, b):
        mean = jnp.mean(h, axis=0, keepdims=True)
        c = h - mean
        var = jnp.mean(c * c, axis=0, keepdims=True)
        return c * jax.lax.rsqrt(var + BN_EPS) * g + b

    f32 = jnp.float32
    x = state.astype(jnp.bfloat16)
    b1q = params["b1"].astype(jnp.bfloat16).astype(f32)   # kernel folds b1 into bf16 w1
    h1 = jnp.dot(x, params["w1"].astype(jnp.bfloat16), preferred_element_type=f32) + b1q
    h1 = leaky(h1)
    if state.shape[0] > 1:
        h1 = bn(h1, params["g1"], params["beta1"])
    h2 = jnp.dot(h1.astype(jnp.bfloat16), params["w2"].astype(jnp.bfloat16),
                 preferred_element_type=f32) + params["b2"]
    h2 = leaky(h2)
    if state.shape[0] > 1:
        h2 = bn(h2, params["g2"], params["beta2"])
    h2b = h2.astype(jnp.bfloat16)
    V = jnp.dot(h2b, params["wv"].astype(jnp.bfloat16), preferred_element_type=f32) + params["bv"]
    A = jnp.dot(h2b, params["wa"].astype(jnp.bfloat16), preferred_element_type=f32) + params["ba"]
    return V, A


if __name__ == "__main__":
    B, D_IN, N_ACTIONS = 8, 32, 4   # len(input_dims)=32, small batch, 4 actions

    key = jax.random.PRNGKey(0)
    k_state, k_params = jax.random.split(key)
    state = jax.random.normal(k_state, (B, D_IN), jnp.float32)
    params = init_params(k_params, D_IN, N_ACTIONS)
    packed = pack_params(params, D_IN)

    # B > 1 path: training-mode BatchNorm with full-batch statistics.
    V, A = jax.block_until_ready(ddqn_forward(state, packed, N_ACTIONS))
    V_ref, A_ref = ddqn_reference(state, params)
    assert V.shape == (B, 1) and A.shape == (B, N_ACTIONS)
    assert jnp.allclose(V, V_ref, atol=2e-3, rtol=2e-3), float(jnp.max(jnp.abs(V - V_ref)))
    assert jnp.allclose(A, A_ref, atol=2e-3, rtol=2e-3), float(jnp.max(jnp.abs(A - A_ref)))

    # B == 1 path: exercises the `if flat.size(0) > 1` skip-BatchNorm branch.
    s1 = state[:1]
    V1, A1 = jax.block_until_ready(ddqn_forward(s1, packed, N_ACTIONS))
    V1_ref, A1_ref = ddqn_reference(s1, params)
    assert jnp.allclose(V1, V1_ref, atol=2e-3, rtol=2e-3), float(jnp.max(jnp.abs(V1 - V1_ref)))
    assert jnp.allclose(A1, A1_ref, atol=2e-3, rtol=2e-3), float(jnp.max(jnp.abs(A1 - A1_ref)))

    print("KERNEL_OK")
</pallas_src>

<mosaic_0001>
module attributes {stable_mosaic.version = 11 : i64} {
  func.func @_ddqn_kernel(%arg0: i32, %arg1: memref<8x128xbf16, #tpu.memory_space<vmem>>, %arg2: memref<128x512xbf16, #tpu.memory_space<vmem>>, %arg3: memref<1x512xf32, #tpu.memory_space<vmem>>, %arg4: memref<1x512xf32, #tpu.memory_space<vmem>>, %arg5: memref<512x128xbf16, #tpu.memory_space<vmem>>, %arg6: memref<1x128xf32, #tpu.memory_space<vmem>>, %arg7: memref<1x128xf32, #tpu.memory_space<vmem>>, %arg8: memref<1x128xf32, #tpu.memory_space<vmem>>, %arg9: memref<128x128xbf16, #tpu.memory_space<vmem>>, %arg10: memref<1x128xf32, #tpu.memory_space<vmem>>, %arg11: memref<8x128xf32, #tpu.memory_space<vmem>>, %arg12: memref<8x512xbf16, #tpu.memory_space<vmem>>) attributes {dimension_semantics = [#tpu.dimension_semantics<arbitrary>], iteration_bounds = array<i64: 4>, scalar_prefetch = 0 : i64, scratch_operands = 1 : i64, tpu.core_type = #tpu.core_type<tc>, window_params = [{pipeline_mode = #tpu.pipeline_mode<synchronous>, transform_indices = @transform_0, window_bounds = array<i64: 8, 128>}, {pipeline_mode = #tpu.pipeline_mode<synchronous>, transform_indices = @transform_1, window_bounds = array<i64: 128, 512>}, {pipeline_mode = #tpu.pipeline_mode<synchronous>, transform_indices = @transform_2, window_bounds = array<i64: 1, 512>}, {pipeline_mode = #tpu.pipeline_mode<synchronous>, transform_indices = @transform_3, window_bounds = array<i64: 1, 512>}, {transform_indices = @transform_4, window_bounds = array<i64: 512, 128>}, {transform_indices = @transform_5, window_bounds = array<i64: 1, 128>}, {transform_indices = @transform_6, window_bounds = array<i64: 1, 128>}, {transform_indices = @transform_7, window_bounds = array<i64: 1, 128>}, {transform_indices = @transform_8, window_bounds = array<i64: 128, 128>}, {pipeline_mode = #tpu.pipeline_mode<synchronous>, transform_indices = @transform_9, window_bounds = array<i64: 1, 128>}, {pipeline_mode = #tpu.pipeline_mode<synchronous>, transform_indices = @transform_10, window_bounds = array<i64: 8, 128>}]} {
    %c0_i32 = arith.constant 0 : i32
    %0 = arith.cmpi eq, %arg0, %c0_i32 : i32
    %1 = arith.extui %0 : i1 to i32
    %c0_i32_0 = arith.constant 0 : i32
    %2 = arith.cmpi ne, %1, %c0_i32_0 : i32
    scf.if %2 {
      %c0_23 = arith.constant 0 : index
      %c0_24 = arith.constant 0 : index
      %40 = vector.load %arg1[%c0_23, %c0_24] : memref<8x128xbf16, #tpu.memory_space<vmem>>, vector<8x128xbf16>
      %c0_25 = arith.constant 0 : index
      %c0_26 = arith.constant 0 : index
      %41 = vector.load %arg2[%c0_25, %c0_26] : memref<128x512xbf16, #tpu.memory_space<vmem>>, vector<128x512xbf16>
      %cst_27 = arith.constant dense<0.000000e+00> : vector<8x512xf32>
      %42 = tpu.matmul %40, %41, %cst_27 {dimension_numbers = #tpu.dot_dimension_numbers<[1], [0], [0], [1], [0, 0, 1, 1], [], []>} : vector<8x128xbf16>, vector<128x512xbf16>, vector<8x512xf32> -> vector<8x512xf32>
      %cst_28 = arith.constant 0.00999999977 : f32
      %43 = vector.broadcast %cst_28 : f32 to vector<8x512xf32>
      %44 = arith.mulf %43, %42 : vector<8x512xf32>
      %45 = arith.maximumf %42, %44 : vector<8x512xf32>
      %c0_29 = arith.constant 0 : index
      %c0_30 = arith.constant 0 : index
      %46 = vector.load %arg3[%c0_29, %c0_30] : memref<1x512xf32, #tpu.memory_space<vmem>>, vector<1x512xf32>
      %c0_31 = arith.constant 0 : index
      %c0_32 = arith.constant 0 : index
      %47 = vector.load %arg4[%c0_31, %c0_32] : memref<1x512xf32, #tpu.memory_space<vmem>>, vector<1x512xf32>
      %cst_33 = arith.constant dense<0.000000e+00> : vector<512xf32>
      %48 = vector.multi_reduction <add>, %45, %cst_33 [0] : vector<8x512xf32> to vector<512xf32>
      %49 = vector.shape_cast %48 : vector<512xf32> to vector<1x512xf32>
      %cst_34 = arith.constant 8.000000e+00 : f32
      %50 = vector.broadcast %cst_34 : f32 to vector<1x512xf32>
      %51 = arith.divf %49, %50 : vector<1x512xf32>
      %52 = vector.broadcast %51 : vector<1x512xf32> to vector<8x512xf32>
      %53 = arith.subf %45, %52 : vector<8x512xf32>
      %54 = arith.mulf %53, %53 : vector<8x512xf32>
      %cst_35 = arith.constant dense<0.000000e+00> : vector<512xf32>
      %55 = vector.multi_reduction <add>, %54, %cst_35 [0] : vector<8x512xf32> to vector<512xf32>
      %56 = vector.shape_cast %55 : vector<512xf32> to vector<1x512xf32>
      %cst_36 = arith.constant 8.000000e+00 : f32
      %57 = vector.broadcast %cst_36 : f32 to vector<1x512xf32>
      %58 = arith.divf %56, %57 : vector<1x512xf32>
      %cst_37 = arith.constant 9.99999974E-6 : f32
      %59 = vector.broadcast %cst_37 : f32 to vector<1x512xf32>
      %60 = arith.addf %58, %59 : vector<1x512xf32>
      %61 = math.rsqrt %60 : vector<1x512xf32>
      %62 = vector.broadcast %61 : vector<1x512xf32> to vector<8x512xf32>
      %63 = arith.mulf %53, %62 : vector<8x512xf32>
      %64 = vector.broadcast %46 : vector<1x512xf32> to vector<8x512xf32>
      %65 = arith.mulf %63, %64 : vector<8x512xf32>
      %66 = vector.broadcast %47 : vector<1x512xf32> to vector<8x512xf32>
      %67 = arith.addf %65, %66 : vector<8x512xf32>
      %68 = arith.truncf %67 : vector<8x512xf32> to vector<8x512xbf16>
      %c0_38 = arith.constant 0 : index
      %c0_39 = arith.constant 0 : index
      %69 = vector.load %arg12[%c0_38, %c0_39] : memref<8x512xbf16, #tpu.memory_space<vmem>>, vector<8x512xbf16>
      tpu.vector_store %arg12[%c0_38, %c0_39], %68 {strides = array<i32>} : memref<8x512xbf16, #tpu.memory_space<vmem>>, vector<8x512xbf16>,
      %c0_40 = arith.constant 0 : index
      %c0_41 = arith.constant 0 : index
      %70 = vector.load %arg10[%c0_40, %c0_41] : memref<1x128xf32, #tpu.memory_space<vmem>>, vector<1x128xf32>
      %71 = vector.shape_cast %70 : vector<1x128xf32> to vector<1x128xf32>
      %72 = vector.broadcast %71 : vector<1x128xf32> to vector<8x128xf32>
      %c0_42 = arith.constant 0 : index
      %c0_43 = arith.constant 0 : index
      %73 = vector.load %arg11[%c0_42, %c0_43] : memref<8x128xf32, #tpu.memory_space<vmem>>, vector<8x128xf32>
      tpu.vector_store %arg11[%c0_42, %c0_43], %72 {strides = array<i32>} : memref<8x128xf32, #tpu.memory_space<vmem>>, vector<8x128xf32>,
    } else {
    }
    %c0 = arith.constant 0 : index
    %c0_1 = arith.constant 0 : index
    %3 = vector.load %arg12[%c0, %c0_1] : memref<8x512xbf16, #tpu.memory_space<vmem>>, vector<8x512xbf16>
    %c0_2 = arith.constant 0 : index
    %c0_3 = arith.constant 0 : index
    %4 = vector.load %arg5[%c0_2, %c0_3] : memref<512x128xbf16, #tpu.memory_space<vmem>>, vector<512x128xbf16>
    %cst = arith.constant dense<0.000000e+00> : vector<8x128xf32>
    %5 = tpu.matmul %3, %4, %cst {dimension_numbers = #tpu.dot_dimension_numbers<[1], [0], [0], [1], [0, 0, 1, 1], [], []>} : vector<8x512xbf16>, vector<512x128xbf16>, vector<8x128xf32> -> vector<8x128xf32>
    %c0_4 = arith.constant 0 : index
    %c0_5 = arith.constant 0 : index
    %6 = vector.load %arg6[%c0_4, %c0_5] : memref<1x128xf32, #tpu.memory_space<vmem>>, vector<1x128xf32>
    %7 = vector.broadcast %6 : vector<1x128xf32> to vector<8x128xf32>
    %8 = arith.addf %5, %7 : vector<8x128xf32>
    %cst_6 = arith.constant 0.00999999977 : f32
    %9 = vector.broadcast %cst_6 : f32 to vector<8x128xf32>
    %10 = arith.mulf %9, %8 : vector<8x128xf32>
    %11 = arith.maximumf %8, %10 : vector<8x128xf32>
    %c0_7 = arith.constant 0 : index
    %c0_8 = arith.constant 0 : index
    %12 = vector.load %arg7[%c0_7, %c0_8] : memref<1x128xf32, #tpu.memory_space<vmem>>, vector<1x128xf32>
    %c0_9 = arith.constant 0 : index
    %c0_10 = arith.constant 0 : index
    %13 = vector.load %arg8[%c0_9, %c0_10] : memref<1x128xf32, #tpu.memory_space<vmem>>, vector<1x128xf32>
    %cst_11 = arith.constant dense<0.000000e+00> : vector<128xf32>
    %14 = vector.multi_reduction <add>, %11, %cst_11 [0] : vector<8x128xf32> to vector<128xf32>
    %15 = vector.shape_cast %14 : vector<128xf32> to vector<1x128xf32>
    %cst_12 = arith.constant 8.000000e+00 : f32
    %16 = vector.broadcast %cst_12 : f32 to vector<1x128xf32>
    %17 = arith.divf %15, %16 : vector<1x128xf32>
    %18 = vector.broadcast %17 : vector<1x128xf32> to vector<8x128xf32>
    %19 = arith.subf %11, %18 : vector<8x128xf32>
    %20 = arith.mulf %19, %19 : vector<8x128xf32>
    %cst_13 = arith.constant dense<0.000000e+00> : vector<128xf32>
    %21 = vector.multi_reduction <add>, %20, %cst_13 [0] : vector<8x128xf32> to vector<128xf32>
    %22 = vector.shape_cast %21 : vector<128xf32> to vector<1x128xf32>
    %cst_14 = arith.constant 8.000000e+00 : f32
    %23 = vector.broadcast %cst_14 : f32 to vector<1x128xf32>
    %24 = arith.divf %22, %23 : vector<1x128xf32>
    %cst_15 = arith.constant 9.99999974E-6 : f32
    %25 = vector.broadcast %cst_15 : f32 to vector<1x128xf32>
    %26 = arith.addf %24, %25 : vector<1x128xf32>
    %27 = math.rsqrt %26 : vector<1x128xf32>
    %28 = vector.broadcast %27 : vector<1x128xf32> to vector<8x128xf32>
    %29 = arith.mulf %19, %28 : vector<8x128xf32>
    %30 = vector.broadcast %12 : vector<1x128xf32> to vector<8x128xf32>
    %31 = arith.mulf %29, %30 : vector<8x128xf32>
    %32 = vector.broadcast %13 : vector<1x128xf32> to vector<8x128xf32>
    %33 = arith.addf %31, %32 : vector<8x128xf32>
    %c0_16 = arith.constant 0 : index
    %c0_17 = arith.constant 0 : index
    %34 = vector.load %arg11[%c0_16, %c0_17] : memref<8x128xf32, #tpu.memory_space<vmem>>, vector<8x128xf32>
    %35 = arith.truncf %33 : vector<8x128xf32> to vector<8x128xbf16>
    %c0_18 = arith.constant 0 : index
    %c0_19 = arith.constant 0 : index
    %36 = vector.load %arg9[%c0_18, %c0_19] : memref<128x128xbf16, #tpu.memory_space<vmem>>, vector<128x128xbf16>
    %cst_20 = arith.constant dense<0.000000e+00> : vector<8x128xf32>
    %37 = tpu.matmul %35, %36, %cst_20 {dimension_numbers = #tpu.dot_dimension_numbers<[1], [0], [0], [1], [0, 0, 1, 1], [], []>} : vector<8x128xbf16>, vector<128x128xbf16>, vector<8x128xf32> -> vector<8x128xf32>
    %38 = arith.addf %34, %37 : vector<8x128xf32>
    %c0_21 = arith.constant 0 : index
    %c0_22 = arith.constant 0 : index
    %39 = vector.load %arg11[%c0_21, %c0_22] : memref<8x128xf32, #tpu.memory_space<vmem>>, vector<8x128xf32>
    tpu.vector_store %arg11[%c0_21, %c0_22], %38 {strides = array<i32>} : memref<8x128xf32, #tpu.memory_space<vmem>>, vector<8x128xf32>,
    return
  }
  func.func @transform_0(%arg0: i32) -> (i32, i32) {
    %c0_i32 = arith.constant 0 : i32
    %c0_i32_0 = arith.constant 0 : i32
    %c0_i32_1 = arith.constant 0 : i32
    return %c0_i32, %c0_i32_0 : i32, i32
  }
  func.func @transform_1(%arg0: i32) -> (i32, i32) {
    %c0_i32 = arith.constant 0 : i32
    %c0_i32_0 = arith.constant 0 : i32
    %c0_i32_1 = arith.constant 0 : i32
    return %c0_i32, %c0_i32_0 : i32, i32
  }
  func.func @transform_2(%arg0: i32) -> (i32, i32) {
    %c0_i32 = arith.constant 0 : i32
    %c0_i32_0 = arith.constant 0 : i32
    %c0_i32_1 = arith.constant 0 : i32
    return %c0_i32, %c0_i32_0 : i32, i32
  }
  func.func @transform_3(%arg0: i32) -> (i32, i32) {
    %c0_i32 = arith.constant 0 : i32
    %c0_i32_0 = arith.constant 0 : i32
    %c0_i32_1 = arith.constant 0 : i32
    return %c0_i32, %c0_i32_0 : i32, i32
  }
  func.func @transform_4(%arg0: i32) -> (i32, i32) {
    %c0_i32 = arith.constant 0 : i32
    %c0_i32_0 = arith.constant 0 : i32
    return %c0_i32, %arg0 : i32, i32
  }
  func.func @transform_5(%arg0: i32) -> (i32, i32) {
    %c0_i32 = arith.constant 0 : i32
    %c0_i32_0 = arith.constant 0 : i32
    return %c0_i32, %arg0 : i32, i32
  }
  func.func @transform_6(%arg0: i32) -> (i32, i32) {
    %c0_i32 = arith.constant 0 : i32
    %c0_i32_0 = arith.constant 0 : i32
    return %c0_i32, %arg0 : i32, i32
  }
  func.func @transform_7(%arg0: i32) -> (i32, i32) {
    %c0_i32 = arith.constant 0 : i32
    %c0_i32_0 = arith.constant 0 : i32
    return %c0_i32, %arg0 : i32, i32
  }
  func.func @transform_8(%arg0: i32) -> (i32, i32) {
    %c0_i32 = arith.constant 0 : i32
    %c0_i32_0 = arith.constant 0 : i32
    return %arg0, %c0_i32 : i32, i32
  }
  func.func @transform_9(%arg0: i32) -> (i32, i32) {
    %c0_i32 = arith.constant 0 : i32
    %c0_i32_0 = arith.constant 0 : i32
    %c0_i32_1 = arith.constant 0 : i32
    return %c0_i32, %c0_i32_0 : i32, i32
  }
  func.func @transform_10(%arg0: i32) -> (i32, i32) {
    %c0_i32 = arith.constant 0 : i32
    %c0_i32_0 = arith.constant 0 : i32
    %c0_i32_1 = arith.constant 0 : i32
    return %c0_i32, %c0_i32_0 : i32, i32
  }
}

</mosaic_0001>

<bundles_post_ra>
// kernel: tpu_custom_call.1
= control target key start
LH: loop header
LB: loop body
LE: loop exit
PB: predicated region body
PF: predicated region fallthrough
CT: control target
= control target key end

     0   :  { %s2493_s0 = inlined_call_operand.hbm [shape: bf16[8,128], index: 0, kind: input, shape index: {}]   ;;  %s2494_s1 = inlined_call_operand.hbm [shape: bf16[128,512], index: 1, kind: input, shape index: {}]   ;;  %s2495_s2 = inlined_call_operand.vmem [shape: f32[1,512], index: 2, kind: input, shape index: {}]   ;;  %s2496_s3 = inlined_call_operand.vmem [shape: f32[1,512], index: 3, kind: input, shape index: {}]   ;;  %s2497_s4 = inlined_call_operand.hbm [shape: bf16[512,512], index: 4, kind: input, shape index: {}]   ;;  %s2498_s5 = inlined_call_operand.vmem [shape: f32[1,512], index: 5, kind: input, shape index: {}]   ;;  %s2499_s6 = inlined_call_operand.vmem [shape: f32[1,512], index: 6, kind: input, shape index: {}]   ;;  %s2500_s7 = inlined_call_operand.vmem [shape: f32[1,512], index: 7, kind: input, shape index: {}]   ;;  %s2501_s8 = inlined_call_operand.hbm [shape: bf16[512,128], index: 8, kind: input, shape index: {}]   ;;  %s2502_s9 = inlined_call_operand.vmem [shape: f32[1,128], index: 9, kind: input, shape index: {}]   ;;  %s2503_s10 = inlined_call_operand.hbm [shape: f32[8,128], index: 10, kind: output, shape index: {}]  }
   0x1   :  { %2514 = sst [smem:[#allocation17_spill]] %s2493_s0 }
   0x2   :  { %2515 = sst [smem:[#allocation18_spill]] %s2495_s2 }
   0x3   :  { %2516 = sst [smem:[#allocation19_spill]] %s2496_s3 }
   0x4   :  { %2517 = sst [smem:[#allocation20_spill]] %s2497_s4 }
   0x5   :  { %2518 = sst [smem:[#allocation21_spill]] %s2503_s10 }
   0x6   :  { %15 = vsyncpa [#allocation4], 0 }
   0x7   :  { %16 = vsyncpa [#allocation7], 0 }
   0x8   :  { %17 = vsyncpa [#allocation5], 0  ;;  %s2157_s13 = smov 0   ;;  %s2159_s14 = smov 0  }
   0x9   :  { %s2161_s15 = smov 0   ;;  %s2163_s16 = smov 0  }
   0xa LB: > { %s2176_s17 = sadd.s32 4294967295, %s2088_s16   ;;  %s2179_s18 = sadd.s32 1, %s2088_s16   ;;  %s2088_s16 = sphi %s2163_s16, %s2546_s16   ;;  %s2084_s15 = sphi %s2161_s15, %s2550_s15   ;;  %s2080_s14 = sphi %s2159_s14, %s2549_s14   ;;  %s2076_s13 = sphi %s2157_s13, %s2548_s13  }
   0xb   : > { %2519 = sst [smem:[#allocation15_spill]] %s2179_s18  ;;  %s111_s19 = ssub.s32 %s2088_s16, %s2179_s18 }
   0xc   : > { %s114_s20 = sadd.s32 1, %s2084_s15  ;;  %p112_p0 = scmp.eq.s32.totalorder %s111_s19, 0 }
   0xd   : > { %p121_p1 = scmp.ne.s32.totalorder %s2084_s15, %s2080_s14  ;;  %p122_p2 = scmp.eq.s32.totalorder %s2088_s16, 0 }
   0xe   : > { %p127_p3 = scmp.ne.s32.totalorder %s2080_s14, %s2076_s13  ;;  %p2504_p5 = scmp.eq.s32.totalorder %s2176_s17, 0 }
   0xf   : > { %s2189_s21 = scalar_select %p112_p0, %s2084_s15, %s114_s20  }
  0x10   : > { %p2191_p4 = por %p122_p2, %p121_p1  ;;  %p1542_p6 = scmp.ge.s32.totalorder %s2088_s16, 1 }
  0x11   : > { %2520 = sst [smem:[#allocation16_spill]] %s2189_s21  ;;  %p284_p7 = scmp.lt.s32.totalorder %s2088_s16, 5 }
  0x12   : > { %p2200_p8 = por %p2504_p5, %p127_p3  ;;  %s2090_s25 = smov [#allocation3]  }
  0x13   : > { %p2205_p10 = pnand %p1542_p6, %p284_p7  ;;  %s297_s26 = sshll.u32 %s2090_s25, 4  ;;  %s298_s26 = int_to_ptr.vmem [resolvable:$true] %s297_s26 }
  0x14   : > { %s2522_s23 = scalar_select %p2200_p8, 1, 0 }
  0x15   : > { %s2523_s24 = scalar_select %p2205_p10, 1, 0 }
  0x16   : > { %p1735_p11 = pneg %p2205_p10  ;;  %p1751_p12 = scmp.lt.s32.totalorder %s2088_s16, 4 }
  0x17   : > { %s330_s28 = sand.u32 1, %s2088_s16   ;;  %s2526_s0 = sld [smem:[#allocation17_spill]] }
  0x18   : > { %p2214_p13 = pnand %p1735_p11, %p2504_p5  ;;  %p2221_p0 = pnand %p1751_p12, %p2191_p4 }
  0x1a   : > { %s2525_s29 = scalar_select %p2221_p0, 1, 0 }
  0x1b   : > { %p2510_p2 = pneg %p2214_p13 }
  0x1d   : > { %s1900_s13 = scalar_lea.hbm %s2526_s0, 64 }
  0x1e   : > { %p1901_p1 = scmp.ne.s32.totalorder %s2526_s0, %s1900_s13  ;;  %p1907_p4 = scmp.lt.u32.totalorder %s1900_s13, %s2526_s0 }
  0x20   : > { %p1903_p3 = pnand %p2510_p2, %p1901_p1 }
  0x22   : > { %p1904_p6 = pneg %p1903_p3 }
  0x24   : > { %p1909_p7 = pnand %p1907_p4, %p1904_p6 }
  0x26   : > { %1912 = shalt.err (!%p1909_p7)
}
  0x27   : > { %s1913_s30 = scalar_lea.vmem %s298_s26, 64  ;;  %p1921_p5 = scmp.lt.s32.totalorder %s298_s26, %s298_s26 }
  0x28   : > { %p1914_p11 = scmp.ne.s32.totalorder %s298_s26, %s1913_s30  ;;  %p1922_p8 = scmp.lt.s32.totalorder %s1913_s30, %s1913_s30 }
  0x2a   : > { %p1916_p12 = pnand %p1914_p11, %p2510_p2  ;;  %p1923_p10 = por %p1922_p8, %p1921_p5 }
  0x2c   : > { %p1917_p9 = pneg %p1916_p12 }
  0x2e   : > { %p1924_p0 = pnand %p1923_p10, %p1917_p9 }
  0x30   : > { %1927 = shalt.err (!%p1924_p0)
}
  0x31   : > { %1738 = dma.hbm_to_vmem [thread:$0]  (!%p2214_p13), %s2526_s0, 64, %s298_s26, [#allocation4]  }
  0x32   : > { %s2527_s13 = sand.u32 1, %s2084_s15   ;;  %s1547_s20 = sshll.u32 %s2088_s16, 6 }
  0x33   : > { %s1546_s19 = sshll.u32 %s2527_s13, 8  ;;  %s2528_s4 = sld [smem:[#allocation20_spill]] }
  0x34   : > { %s334_s21 = scalar_lea.vmem [#allocation8], %s1546_s19  ;;  %s2258_s11 = scalar_lea.sflag [#allocation4], %s330_s28 }
  0x35   : > { %s340_s18 = sshll.u32 %s334_s21, 4  ;;  %p2529_p8 = scmp.ne.s32.totalorder %s2525_s29, 0  ;;  %s2256_s18 = int_to_ptr.vmem [resolvable:$true] %s340_s18 }
  0x37   : > { %p2512_p9 = pneg %p2529_p8 }
  0x39   : > { %s2254_s30 = scalar_lea.hbm %s2528_s4, %s1547_s20  ;;  %s1933_s20 = scalar_lea.hbm %s2528_s4, 16384 }
  0x3a   : > { %s1928_s12 = scalar_lea.hbm %s2254_s30, 4096  ;;  %p1934_p1 = scmp.lt.u32.totalorder %s2254_s30, %s2528_s4 }
  0x3b   : > { %p1929_p5 = scmp.ne.s32.totalorder %s2254_s30, %s1928_s12  ;;  %p1935_p3 = scmp.lt.u32.totalorder %s1933_s20, %s1928_s12 }
  0x3c   : > { %p1937_p4 = scmp.lt.u32.totalorder %s1928_s12, %s2254_s30 }
  0x3d   : > { %p1931_p10 = pnand %p2512_p9, %p1929_p5  ;;  %p1936_p6 = por %p1935_p3, %p1934_p1 }
  0x3f   : > { %p1932_p0 = pneg %p1931_p10  ;;  %p1938_p7 = por %p1937_p4, %p1936_p6 }
  0x41   : > { %p1939_p11 = pnand %p1938_p7, %p1932_p0 }
  0x43   : > { %1942 = shalt.err (!%p1939_p11)
}
  0x44   : > { %s1943_s21 = scalar_lea.vmem %s2256_s18, 4096  ;;  %s2091_s28 = smov [#allocation8]  }
  0x45   : > { %p1944_p12 = scmp.ne.s32.totalorder %s2256_s18, %s1943_s21  ;;  %s1948_s19 = sshll.u32 %s2091_s28, 4  ;;  %s1949_s19 = int_to_ptr.vmem [resolvable:$false] %s1948_s19 }
  0x46   : > { %s1950_s26 = scalar_lea.vmem %s1949_s19, 8192  ;;  %p1951_p2 = scmp.lt.s32.totalorder %s2256_s18, %s1949_s19 }
  0x47   : > { %p1946_p5 = pnand %p1944_p12, %p2512_p9  ;;  %p1952_p1 = scmp.lt.s32.totalorder %s1950_s26, %s1943_s21 }
  0x49   : > { %p1947_p10 = pneg %p1946_p5  ;;  %p1953_p3 = por %p1952_p1, %p1951_p2 }
  0x4b   : > { %p1954_p6 = pnand %p1953_p3, %p1947_p10 }
  0x4d   : > { %1957 = shalt.err (!%p1954_p6)
}
  0x4e   : > { %s2092_s12 = smov 256   ;;  %s2093_s13 = smov 64  }
  0x4f   : > { %s2094_s20 = smov 4   ;;  %s2095_s22 = smov [#allocation6]  }
  0x50   : > { %1745 = dma.hbm_to_vmem [thread:$0]  (!%p2529_p8), %s2254_s30, 4096, %s2256_s18, %s2258_s11, %s2092_s12, %s2093_s13, %s2094_s20  }
  0x51   : > { %s307_s25 = sshll.u32 %s2095_s22, 4  ;;  %s2530_s21 = sand.u32 1, %s2084_s15   ;;  %s308_s25 = int_to_ptr.vmem [resolvable:$true] %s307_s25 }
  0x52   : > { %s1548_s28 = sshll.u32 %s2530_s21, 6  ;;  %s1958_s0 = scalar_lea.hbm %s2494_s1, 4096 }
  0x53   : > { %p1959_p2 = scmp.ne.s32.totalorder %s2494_s1, %s1958_s0  ;;  %p2531_p0 = pneg %p2214_p13 }
  0x54   : > { %p1965_p11 = scmp.lt.u32.totalorder %s1958_s0, %s2494_s1 }
  0x55   : > { %p1961_p4 = pnand %p1959_p2, %p2531_p0 }
  0x57   : > { %p1962_p7 = pneg %p1961_p4 }
  0x59   : > { %p1967_p12 = pnand %p1965_p11, %p1962_p7 }
  0x5b   : > { %1970 = shalt.err (!%p1967_p12)
}
  0x5c   : > { %s1971_s18 = scalar_lea.vmem %s308_s25, 4096  ;;  %p2532_p10 = pmov %p2531_p0 }
  0x5d   : > { %p1972_p5 = scmp.ne.s32.totalorder %s308_s25, %s1971_s18  ;;  %p1979_p6 = scmp.lt.s32.totalorder %s308_s25, %s308_s25 }
  0x5e   : > { %p1980_p9 = scmp.lt.s32.totalorder %s1971_s18, %s1971_s18 }
  0x5f   : > { %p1974_p1 = pnand %p1972_p5, %p2532_p10 }
  0x60   : > { %p1981_p8 = por %p1980_p9, %p1979_p6 }
  0x61   : > { %p1975_p3 = pneg %p1974_p1 }
  0x63   : > { %p1982_p0 = pnand %p1981_p8, %p1975_p3 }
  0x65   : > { %1985 = shalt.err (!%p1982_p0)
}
  0x66   : > { %s2096_s4 = smov 16   ;;  %s1643_s0 = sshll.u32 %s2088_s16, 10 }
  0x67   : > { %1741 = dma.hbm_to_vmem [thread:$0]  (!%p2214_p13), %s2494_s1, 4096, %s308_s25, [#allocation7], %s2092_s12, %s2092_s12, %s2096_s4  }
  0x68   : > { %s2314_s22 = scalar_lea.hbm %s2501_s8, %s1643_s0  ;;  %s372_s21 = scalar_lea.vmem [#allocation9], %s1548_s28 }
  0x69   : > { %s379_s19 = sshll.u32 %s372_s21, 4  ;;  %s1986_s27 = scalar_lea.hbm %s2314_s22, 1024  ;;  %s2316_s19 = int_to_ptr.vmem [resolvable:$true] %s379_s19 }
  0x6a   : > { %p1987_p8 = scmp.ne.s32.totalorder %s2314_s22, %s1986_s27  ;;  %p2533_p9 = scmp.ne.s32.totalorder %s2525_s29, 0 }
  0x6b   : > { %s1991_s25 = scalar_lea.hbm %s2501_s8, 4096  ;;  %p1992_p7 = scmp.lt.u32.totalorder %s2314_s22, %s2501_s8 }
  0x6c   : > { %p2534_p2 = pneg %p2533_p9  ;;  %p1993_p11 = scmp.lt.u32.totalorder %s1991_s25, %s1986_s27 }
  0x6d   : > { %p1995_p5 = scmp.lt.u32.totalorder %s1986_s27, %s2314_s22 }
  0x6e   : > { %p1989_p4 = pnand %p1987_p8, %p2534_p2  ;;  %p1994_p12 = por %p1993_p11, %p1992_p7 }
  0x70   : > { %p1990_p13 = pneg %p1989_p4  ;;  %p1996_p10 = por %p1995_p5, %p1994_p12 }
  0x72   : > { %p1997_p1 = pnand %p1996_p10, %p1990_p13 }
  0x74   : > { %2000 = shalt.err (!%p1997_p1)
}
  0x75   : > { %s2001_s28 = scalar_lea.vmem %s2316_s19, 1024  ;;  %p2535_p6 = pmov %p2534_p2 }
  0x76   : > { %p2002_p3 = scmp.ne.s32.totalorder %s2316_s19, %s2001_s28  ;;  %s2097_s4 = smov [#allocation9]  }
  0x77   : > { %s2006_s10 = sshll.u32 %s2097_s4, 4  ;;  %s2007_s10 = int_to_ptr.vmem [resolvable:$false] %s2006_s10 }
  0x78   : > { %p2004_p0 = pnand %p2002_p3, %p2535_p6  ;;  %s2008_s2 = scalar_lea.vmem %s2007_s10, 2048 }
  0x79   : > { %p2009_p2 = scmp.lt.s32.totalorder %s2316_s19, %s2007_s10  ;;  %p2010_p4 = scmp.lt.s32.totalorder %s2008_s2, %s2001_s28 }
  0x7a   : > { %p2005_p8 = pneg %p2004_p0 }
  0x7b   : > { %p2011_p7 = por %p2010_p4, %p2009_p2 }
  0x7d   : > { %p2012_p11 = pnand %p2011_p7, %p2005_p8 }
  0x7f   : > { %2015 = shalt.err (!%p2012_p11)
}
  0x80   : > { %1748 = dma.hbm_to_vmem [thread:$0]  (!%p2533_p9), %s2314_s22, 1024, %s2316_s19, %s2258_s11, %s2093_s13, %s2093_s13, %s2094_s20  }
  0x81   : > { %p2536_p13 = scmp.ne.s32.totalorder %s2523_s24, 0 }
  0x82   : > { %p2537_p12 = scmp.eq.s32.totalorder (!%p2536_p13), %s2176_s17, 0 }
  0x83   : > { %391 = sbr.rel (%p2536_p13) target bundleno = 1003 (0x3eb), region = 60 }
  0x8a   : > { %2059 = dma.done.wait (%p2537_p12), [#allocation4], 64   ;;  %p2538_p5 = pmov %p2537_p12 }
  0x8c   : > { %2061 = vsyncadd (%p2538_p5), [#allocation4], 4294967232  ;;  %p2539_p10 = pmov %p2538_p5 }
  0x8d   : > { %p2540_p1 = pmov %p2538_p5 }
  0x8e   : > { %2063 = dma.done.wait (%p2539_p10), [#allocation7], 4096  }
  0x8f   : > { %2065 = vsyncadd (%p2540_p1), [#allocation7], 4294963200  ;;  %s401_s29 = sand.u32 1, %s2176_s17   ;;  %s403_s11 = sand.u32 1, %s2080_s14  }
  0x90   : > { %s1554_s13 = sshll.u32 %s403_s11, 8  ;;  %s402_s24 = scalar_lea.sflag [#allocation4], %s401_s29 }
  0x91   : > { %s2357_s20 = scalar_lea.vmem [#allocation8], %s1554_s13  ;;  %p2541_p9 = scmp.ne.s32.totalorder %s2522_s23, 0 }
  0x93   : > { %2067 = dma.done.wait (%p2541_p9), %s402_s24, 5120  }
  0x94   : > { %2069 = vsyncadd (%p2541_p9), %s402_s24, 4294962176  ;;  %s1555_s0 = sshll.u32 %s403_s11, 6  ;;  %p460_p3 = scmp.lt.s32.totalorder %s2176_s17, 3 }
  0x95   : > { %s2379_s26 = scalar_lea.vmem [#allocation9], %s1555_s0  ;;  %p2542_p6 = scmp.ne.s32.totalorder %s2176_s17, 0 }
  0x96   : > { %s2365_s3 = scalar_select %p460_p3, %s2176_s17, 3 }
  0x97   : > { %474 = sbr.rel (%p2542_p6) target bundleno = 458 (0x1ca), region = 80  ;;  %v1798_v0 = vld [vmem:[#allocation6 + $0x4] ss:$16 sps:$4 sm:$0xff] (!%p2542_p6)   ;;  %v1800_v1 = vld [vmem:[#allocation6 + $0xc] ss:$16 sps:$4 sm:$0xff] (!%p2542_p6)   ;;  %v2098_v2 = vmov (!%p2542_p6), 0  }
  0x98   : > { %s462_s21 = scalar_lea.vmem %s2498_s5, %s2365_s3  ;;  %s465_s16 = scalar_lea.vmem %s2499_s6, %s2365_s3  ;;  %700 = vmatprep.mubr.bf16.mxu0 (!%p2542_p6), %v2098_v2  ;;  %741 = vmatprep.mubr.bf16.mxu1 (!%p2542_p6), %v2098_v2  ;;  %v1802_v3 = vld [vmem:[#allocation6] ss:$16 sps:$4 sm:$0xff] (!%p2542_p6)   ;;  %v1803_v4 = vld [vmem:[#allocation6 + $0x8] ss:$16 sps:$4 sm:$0xff] (!%p2542_p6)   ;;  %v1804_v5 = vld [vmem:[#allocation6 + $0x24] ss:$16 sps:$4 sm:$0xff] (!%p2542_p6)  }
  0x99   : > { %s468_s25 = scalar_lea.vmem %s2500_s7, %s2365_s3  ;;  %668 = vmatprep.subr.bf16.mxu0 (!%p2542_p6), %v1798_v0  ;;  %709 = vmatprep.subr.bf16.mxu1 (!%p2542_p6), %v1800_v1  ;;  %v1806_v6 = vld [vmem:[#allocation6 + $0x2c] ss:$16 sps:$4 sm:$0xff] (!%p2542_p6)   ;;  %v1808_v7 = vld [vmem:[#allocation6 + $0x20] ss:$16 sps:$4 sm:$0xff] (!%p2542_p6)   ;;  %v1809_v8 = vld [vmem:[#allocation6 + $0x28] ss:$16 sps:$4 sm:$0xff] (!%p2542_p6)  }
  0x9a   : > { %669 = vmatpush1.bf16.msra.mxu0 (!%p2542_p6), %v1802_v3  ;;  %710 = vmatpush1.bf16.msra.mxu1 (!%p2542_p6), %v1803_v4  ;;  %v1810_v9 = vld [vmem:[#allocation6 + $0x44] ss:$16 sps:$4 sm:$0xff] (!%p2542_p6)   ;;  %v1812_v10 = vld [vmem:[#allocation6 + $0x4c] ss:$16 sps:$4 sm:$0xff] (!%p2542_p6)   ;;  %v1814_v11 = vld [vmem:[#allocation6 + $0x40] ss:$16 sps:$4 sm:$0xff] (!%p2542_p6)  }
  0x9b   : > { %670 = vmatprep.subr.bf16.mxu0 (!%p2542_p6), %v1804_v5  ;;  %711 = vmatprep.subr.bf16.mxu1 (!%p2542_p6), %v1806_v6  ;;  %v1815_v12 = vld [vmem:[#allocation6 + $0x48] ss:$16 sps:$4 sm:$0xff] (!%p2542_p6)   ;;  %v1816_v13 = vld [vmem:[#allocation6 + $0x64] ss:$16 sps:$4 sm:$0xff] (!%p2542_p6)   ;;  %v1818_v14 = vld [vmem:[#allocation6 + $0x6c] ss:$16 sps:$4 sm:$0xff] (!%p2542_p6)  }
  0x9c   : > { %v1820_v15 = vld [vmem:[#allocation6 + $0x60] ss:$16 sps:$4 sm:$0xff] (!%p2542_p6)   ;;  %v1821_v16 = vld [vmem:[#allocation6 + $0x68] ss:$16 sps:$4 sm:$0xff] (!%p2542_p6)   ;;  %v1822_v17 = vld [vmem:[#allocation6 + $0x84] ss:$16 sps:$4 sm:$0xff] (!%p2542_p6)  }
  0x9d   : > { %v1824_v18 = vld [vmem:[#allocation6 + $0x8c] ss:$16 sps:$4 sm:$0xff] (!%p2542_p6)   ;;  %v1826_v19 = vld [vmem:[#allocation6 + $0x80] ss:$16 sps:$4 sm:$0xff] (!%p2542_p6)   ;;  %v1827_v20 = vld [vmem:[#allocation6 + $0x88] ss:$16 sps:$4 sm:$0xff] (!%p2542_p6)  }
  0x9e   : > { %671 = vmatpush1.bf16.msra.mxu0 %v1808_v7  ;;  %712 = vmatpush1.bf16.msra.mxu1 %v1809_v8  ;;  %v1828_v21 = vld [vmem:[#allocation6 + $0xa4] ss:$16 sps:$4 sm:$0xff]   ;;  %v1830_v22 = vld [vmem:[#allocation6 + $0xac] ss:$16 sps:$4 sm:$0xff]   ;;  %v1832_v23 = vld [vmem:[#allocation6 + $0xa0] ss:$16 sps:$4 sm:$0xff]  }
  0x9f   : > { %672 = vmatprep.subr.bf16.mxu0 %v1810_v9  ;;  %713 = vmatprep.subr.bf16.mxu1 %v1812_v10  ;;  %v1833_v24 = vld [vmem:[#allocation6 + $0xa8] ss:$16 sps:$4 sm:$0xff]   ;;  %v1834_v25 = vld [vmem:[#allocation6 + $0xc4] ss:$16 sps:$4 sm:$0xff]   ;;  %v1836_v26 = vld [vmem:[#allocation6 + $0xcc] ss:$16 sps:$4 sm:$0xff]  }
  0xa0   : > { %v1838_v27 = vld [vmem:[#allocation6 + $0xc0] ss:$16 sps:$4 sm:$0xff]   ;;  %v1839_v28 = vld [vmem:[#allocation6 + $0xc8] ss:$16 sps:$4 sm:$0xff]   ;;  %v1840_v29 = vld [vmem:[#allocation6 + $0xe4] ss:$16 sps:$4 sm:$0xff]  }
  0xa1   : > { %v1842_v30 = vld [vmem:[#allocation6 + $0xec] ss:$16 sps:$4 sm:$0xff]   ;;  %v1844_v31 = vld [vmem:[#allocation6 + $0xe0] ss:$16 sps:$4 sm:$0xff]   ;;  %v1845_v32 = vld [vmem:[#allocation6 + $0xe8] ss:$16 sps:$4 sm:$0xff]  }
  0xa2   : > { %673 = vmatpush1.bf16.msra.mxu0 %v1814_v11  ;;  %714 = vmatpush1.bf16.msra.mxu1 %v1815_v12  ;;  %v475_v33 = vld [vmem:[#allocation3] sm:$0xf]  ;;  %v1591_v34 = vld [vmem:[%s2502_s9] ss:$0 sm:$0xff]  ;;  %s2543_s2 = sld [smem:[#allocation18_spill]]  ;;  %s2544_s13 = sld [smem:[#allocation19_spill]] }
  0xa3   : > { %674 = vmatprep.subr.bf16.mxu0 %v1816_v13  ;;  %715 = vmatprep.subr.bf16.mxu1 %v1818_v14  ;;  %912 = vst [vmem:[#allocation10] sm:$0xff] %v1591_v34 }
  0xa6   : > { %675 = vmatpush1.bf16.msra.mxu0 %v1820_v15  ;;  %716 = vmatpush1.bf16.msra.mxu1 %v1821_v16 }
  0xa7   : > { %676 = vmatprep.subr.bf16.mxu0 %v1822_v17  ;;  %717 = vmatprep.subr.bf16.mxu1 %v1824_v18 }
  0xaa   : > { %677 = vmatpush1.bf16.msra.mxu0 %v1826_v19  ;;  %718 = vmatpush1.bf16.msra.mxu1 %v1827_v20 }
  0xab   : > { %678 = vmatprep.subr.bf16.mxu0 %v1828_v21  ;;  %719 = vmatprep.subr.bf16.mxu1 %v1830_v22 }
  0xae   : > { %679 = vmatpush1.bf16.msra.mxu0 %v1832_v23  ;;  %720 = vmatpush1.bf16.msra.mxu1 %v1833_v24 }
  0xaf   : > { %680 = vmatprep.subr.bf16.mxu0 %v1834_v25  ;;  %721 = vmatprep.subr.bf16.mxu1 %v1836_v26 }
  0xb2   : > { %681 = vmatpush1.bf16.msra.mxu0 %v1838_v27  ;;  %722 = vmatpush1.bf16.msra.mxu1 %v1839_v28 }
  0xb3   : > { %682 = vmatprep.subr.bf16.mxu0 %v1840_v29  ;;  %723 = vmatprep.subr.bf16.mxu1 %v1842_v30 }
  0xb6   : > { %683 = vmatpush1.bf16.msra.mxu0 %v1844_v31  ;;  %724 = vmatpush1.bf16.msra.mxu1 %v1845_v32 }
  0xb9   : > { %701 = vmatmul.mubr.bf16.vlgmr.msra.gmra.mrb[0].mxu0 %v475_v33  ;;  %742 = vmatmul.mubr.bf16.vlgmr.msra.gmra.mrb[0].mxu1 %v475_v33 }
 0x18c   : > { %v702_v35 = vpop.f32.mrb[0].mxu0  ;;  %v743_v36 = vpop.f32.mrb[0].mxu1 }
 0x18d   : > { %v750_v37 = vmul.f32 0.01, %v702_v35  ;;  %v752_v38 = vmul.f32 0.01, %v743_v36  ;;  %v704_v39 = vpop.f32.mrb[1].mxu0  ;;  %v745_v40 = vpop.f32.mrb[1].mxu1 }
 0x18e   : > { %v751_v41 = vmul.f32 0.01, %v704_v39  ;;  %v753_v42 = vmul.f32 0.01, %v745_v40  ;;  %v706_v43 = vpop.f32.mrb[2].mxu0  ;;  %v747_v44 = vpop.f32.mrb[2].mxu1 }
 0x18f   : > { %v754_v45 = vmax.f32 %v702_v35, %v750_v37  ;;  %v756_v46 = vmax.f32 %v743_v36, %v752_v38  ;;  %v707_v47 = vpop.f32.mrb[3].mxu0  ;;  %v748_v48 = vpop.f32.mrb[3].mxu1 }
 0x190   : > { %v755_v49 = vmax.f32 %v704_v39, %v751_v41  ;;  %v757_v50 = vmax.f32 %v745_v40, %v753_v42 }
 0x191   : > { %v760_v51 = vrot.slane %v754_v45, 4  ;;  %v772_v52 = vrot.slane %v756_v46, 4 }
 0x192   : > { %v766_v53 = vrot.slane %v755_v49, 4  ;;  %v778_v54 = vrot.slane %v757_v50, 4 }
 0x193   : > { %v761_v55 = vadd.f32 %v760_v51, %v754_v45  ;;  %v773_v56 = vadd.f32 %v772_v52, %v756_v46 }
 0x194   : > { %v767_v57 = vadd.f32 %v766_v53, %v755_v49  ;;  %v779_v58 = vadd.f32 %v778_v54, %v757_v50 }
 0x195   : > { %v762_v59 = vrot.slane %v761_v55, 2  ;;  %v774_v60 = vrot.slane %v773_v56, 2 }
 0x196   : > { %v768_v61 = vrot.slane %v767_v57, 2  ;;  %v780_v62 = vrot.slane %v779_v58, 2 }
 0x197   : > { %v763_v63 = vadd.f32 %v762_v59, %v761_v55  ;;  %v775_v0 = vadd.f32 %v774_v60, %v773_v56 }
 0x198   : > { %v769_v1 = vadd.f32 %v768_v61, %v767_v57  ;;  %v781_v2 = vadd.f32 %v780_v62, %v779_v58  ;;  %v758_v58 = vld [vmem:[%s2543_s2] sm:$0xf] }
 0x199   : > { %v764_v3 = vrot.slane %v763_v63, 1  ;;  %v776_v4 = vrot.slane %v775_v0, 1  ;;  %v759_v61 = vld [vmem:[%s2544_s13] sm:$0xf] }
 0x19a   : > { %v770_v5 = vrot.slane %v769_v1, 1  ;;  %v782_v6 = vrot.slane %v781_v2, 1 }
 0x19b   : > { %v765_v7 = vadd.f32 %v764_v3, %v763_v63  ;;  %v777_v8 = vadd.f32 %v776_v4, %v775_v0 }
 0x19c   : > { %v771_v9 = vadd.f32 %v770_v5, %v769_v1  ;;  %v783_v10 = vadd.f32 %v782_v6, %v781_v2 }
 0x19d   : > { %v785_v11 = vmul.f32 0.125, %v765_v7  ;;  %v787_v12 = vmul.f32 0.125, %v777_v8 }
 0x19e   : > { %v786_v13 = vmul.f32 0.125, %v771_v9  ;;  %v788_v14 = vmul.f32 0.125, %v783_v10 }
 0x19f   : > { %v789_v15 = vsub.f32 %v754_v45, %v785_v11  ;;  %v791_v16 = vsub.f32 %v756_v46, %v787_v12 }
 0x1a0   : > { %v2386_v17 = vsub.f32 %v755_v49, %v786_v13  ;;  %v2388_v18 = vsub.f32 %v757_v50, %v788_v14  ;;  %v838_v49 = vlaneseq }
 0x1a1   : > { %v793_v19 = vmul.f32 %v789_v15, %v789_v15  ;;  %v795_v20 = vmul.f32 %v791_v16, %v791_v16 }
 0x1a2   : > { %v794_v21 = vmul.f32 %v2386_v17, %v2386_v17  ;;  %v796_v22 = vmul.f32 %v2388_v18, %v2388_v18  ;;  %v839_v56 = vshrl.u32 %v838_v49, 7 }
 0x1a3   : > { %v797_v23 = vrot.slane %v793_v19, 4  ;;  %v809_v24 = vrot.slane %v795_v20, 4 }
 0x1a4   : > { %v803_v25 = vrot.slane %v794_v21, 4  ;;  %v815_v26 = vrot.slane %v796_v22, 4  ;;  %v840_v57 = vsub.s32 0, %v839_v56  ;;  %v848_v59 = vsub.s32 2, %v839_v56 }
 0x1a5   : > { %v798_v27 = vadd.f32 %v797_v23, %v793_v19  ;;  %v810_v28 = vadd.f32 %v809_v24, %v795_v20  ;;  %v844_v60 = vsub.s32 1, %v839_v56  ;;  %v852_v62 = vsub.s32 3, %v839_v56 }
 0x1a6   : > { %v804_v29 = vadd.f32 %v803_v25, %v794_v21  ;;  %v816_v30 = vadd.f32 %v815_v26, %v796_v22  ;;  %v841_v63 = vrot.slane %v758_v58, %v840_v57  ;;  %v849_v1 = vrot.slane %v758_v58, %v848_v59 }
 0x1a7   : > { %v799_v31 = vrot.slane %v798_v27, 2  ;;  %v811_v32 = vrot.slane %v810_v28, 2  ;;  %v866_v4 = vrot.slane %v759_v61, %v840_v57  ;;  %v845_v5 = vrot.slane %v758_v58, %v844_v60 }
 0x1a8   : > { %v805_v33 = vrot.slane %v804_v29, 2  ;;  %v817_v34 = vrot.slane %v816_v30, 2  ;;  %v874_v8 = vrot.slane %v759_v61, %v848_v59  ;;  %v853_v9 = vrot.slane %v758_v58, %v852_v62 }
 0x1a9   : > { %v800_v35 = vadd.f32 %v799_v31, %v798_v27  ;;  %v812_v36 = vadd.f32 %v811_v32, %v810_v28  ;;  %v870_v13 = vrot.slane %v759_v61, %v844_v60  ;;  %v878_v20 = vrot.slane %v759_v61, %v852_v62 }
 0x1aa   : > { %v806_v37 = vadd.f32 %v805_v33, %v804_v29  ;;  %v818_v38 = vadd.f32 %v817_v34, %v816_v30 }
 0x1ab   : > { %v801_v39 = vrot.slane %v800_v35, 1  ;;  %v813_v40 = vrot.slane %v812_v36, 1 }
 0x1ac   : > { %v807_v41 = vrot.slane %v806_v37, 1  ;;  %v819_v42 = vrot.slane %v818_v38, 1 }
 0x1ad   : > { %v802_v43 = vadd.f32 %v801_v39, %v800_v35  ;;  %v814_v44 = vadd.f32 %v813_v40, %v812_v36 }
 0x1ae   : > { %v808_v45 = vadd.f32 %v807_v41, %v806_v37  ;;  %v820_v46 = vadd.f32 %v819_v42, %v818_v38 }
 0x1af   : > { %v821_v47 = vmul.f32 0.125, %v802_v43  ;;  %v823_v48 = vmul.f32 0.125, %v814_v44 }
 0x1b0   : > { %v822_v50 = vmul.f32 0.125, %v808_v45  ;;  %v824_v51 = vmul.f32 0.125, %v820_v46 }
 0x1b1   : > { %v825_v52 = vadd.f32 1e-05, %v821_v47  ;;  %v827_v53 = vadd.f32 1e-05, %v823_v48 }
 0x1b2   : > { %v826_v54 = vadd.f32 1e-05, %v822_v50  ;;  %v828_v55 = vadd.f32 1e-05, %v824_v51 }
 0x1b3   : > { %1846 = vrsqrt.f32 %v825_v52 }
 0x1b4   : > { %1848 = vrsqrt.f32 %v827_v53 }
 0x1b5   : > { %1850 = vrsqrt.f32 %v826_v54 }
 0x1b6   : > { %1852 = vrsqrt.f32 %v828_v55 }
 0x1bd   : > { %v1847_v0 = vpop.eup %1846 }
 0x1be   : > { %v1849_v2 = vpop.eup %1848  ;;  %v833_v3 = vmul.f32 %v1847_v0, %v789_v15 }
 0x1bf   : > { %v1851_v6 = vpop.eup %1850  ;;  %v835_v7 = vmul.f32 %v1849_v2, %v791_v16 }
 0x1c0   : > { %v1853_v10 = vpop.eup %1852  ;;  %v858_v11 = vmul.f32 %v841_v63, %v833_v3  ;;  %v834_v12 = vmul.f32 %v1851_v6, %v2386_v17 }
 0x1c1   : > { %v860_v14 = vmul.f32 %v849_v1, %v835_v7  ;;  %v836_v19 = vmul.f32 %v1853_v10, %v2388_v18 }
 0x1c2   : > { %v883_v21 = vadd.f32 %v866_v4, %v858_v11  ;;  %v859_v22 = vmul.f32 %v845_v5, %v834_v12 }
 0x1c3   : > { %v885_v23 = vadd.f32 %v874_v8, %v860_v14  ;;  %v861_v24 = vmul.f32 %v853_v9, %v836_v19 }
 0x1c4   : > { %v884_v15 = vadd.f32 %v870_v13, %v859_v22 }
 0x1c5   : > { %v886_v25 = vadd.f32 %v878_v20, %v861_v24 }
 0x1c6   : > { %v1644_v26 = vpack.c.bf16 %v884_v15, %v883_v21 }
 0x1c7   : > { %v1645_v27 = vpack.c.bf16 %v886_v25, %v885_v23 }
 0x1c8   : > { %903 = vst [vmem:[#allocation2] sm:$0xff] %v1644_v26 }
 0x1c9   : > { %904 = vst [vmem:[#allocation2 + $0x8] sm:$0xff] %v1645_v27 }
 0x1ca PF: > { %v1854_v16 = vld [vmem:[%s2357_s20 + $0x40] sm:$0xff]   ;;  %v1858_v29 = vld [vmem:[%s2357_s20 + $0x48] sm:$0xff]   ;;  %v1862_v33 = vld [vmem:[%s2357_s20 + $0x50] sm:$0xff]   ;;  %v2099_v0 = vmov 0.0   ;;  %vm2100_vm0 = vmmov 0   ;;  %s2101_s19 = smov [#allocation10]  }
 0x1cb   : > { %v1855_v17 = vld [vmem:[%s2357_s20 + $0xc0] sm:$0xff]   ;;  %1646 = vmatprep.subr.bf16.mxu0 %v1854_v16  ;;  %v1859_v30 = vld [vmem:[%s2357_s20 + $0xc8] sm:$0xff]   ;;  %v1863_v34 = vld [vmem:[%s2357_s20 + $0xd0] sm:$0xff]   ;;  %s1425_s27 = sshll.u32 %s2101_s19, 4  ;;  %p1754_p0 = scmp.eq.s32.totalorder %s2176_s17, 3  ;;  %s1426_s27 = int_to_ptr.vmem [resolvable:$true] %s1425_s27 }
 0x1cc   : > { %v1856_v18 = vld [vmem:[%s2357_s20] sm:$0xff]   ;;  %1668 = vmatprep.subr.bf16.mxu1 %v1855_v17  ;;  %v1860_v31 = vld [vmem:[%s2357_s20 + $0x8] sm:$0xff]   ;;  %v1864_v35 = vld [vmem:[%s2357_s20 + $0x10] sm:$0xff]   ;;  %p2023_p7 = scmp.lt.s32.totalorder %s1426_s27, %s1426_s27 }
 0x1cd   : > { %v1857_v28 = vld [vmem:[%s2357_s20 + $0x80] sm:$0xff]   ;;  %1647 = vmatpush3.bf16.msra.mxu0 %v1856_v18  ;;  %v1861_v32 = vld [vmem:[%s2357_s20 + $0x88] sm:$0xff]   ;;  %v1865_v36 = vld [vmem:[%s2357_s20 + $0x90] sm:$0xff]  }
 0x1ce   : > { %1669 = vmatpush3.bf16.msra.mxu1 %v1857_v28  ;;  %1648 = vmatprep.subr.bf16.mxu0 %v1858_v29  ;;  %v1866_v37 = vld [vmem:[%s2357_s20 + $0x58] sm:$0xff]   ;;  %v1870_v41 = vld [vmem:[%s2357_s20 + $0x60] sm:$0xff]   ;;  %v1874_v45 = vld [vmem:[%s2357_s20 + $0x68] sm:$0xff]  }
 0x1cf   : > { %1670 = vmatprep.subr.bf16.mxu1 %v1859_v30  ;;  %v1867_v38 = vld [vmem:[%s2357_s20 + $0xd8] sm:$0xff]   ;;  %v1871_v42 = vld [vmem:[%s2357_s20 + $0xe0] sm:$0xff]   ;;  %v1875_v46 = vld [vmem:[%s2357_s20 + $0xe8] sm:$0xff]  }
 0x1d0   : > { %v1868_v39 = vld [vmem:[%s2357_s20 + $0x18] sm:$0xff]   ;;  %v1872_v43 = vld [vmem:[%s2357_s20 + $0x20] sm:$0xff]   ;;  %v1876_v47 = vld [vmem:[%s2357_s20 + $0x28] sm:$0xff]  }
 0x1d1   : > { %1649 = vmatpush3.bf16.msra.mxu0 %v1860_v31  ;;  %v1869_v40 = vld [vmem:[%s2357_s20 + $0x98] sm:$0xff]   ;;  %v1873_v44 = vld [vmem:[%s2357_s20 + $0xa0] sm:$0xff]   ;;  %v1877_v48 = vld [vmem:[%s2357_s20 + $0xa8] sm:$0xff]  }
 0x1d2   : > { %1671 = vmatpush3.bf16.msra.mxu1 %v1861_v32  ;;  %1650 = vmatprep.subr.bf16.mxu0 %v1862_v33  ;;  %v1878_v49 = vld [vmem:[%s2357_s20 + $0x70] sm:$0xff]   ;;  %v1882_v53 = vld [vmem:[%s2357_s20 + $0x78] sm:$0xff]   ;;  %v1890_v63 = vld [vmem:[%s2379_s26] sm:$0xff]  }
 0x1d3   : > { %1672 = vmatprep.subr.bf16.mxu1 %v1863_v34  ;;  %v1879_v50 = vld [vmem:[%s2357_s20 + $0xf0] sm:$0xff]   ;;  %v1883_v54 = vld [vmem:[%s2357_s20 + $0xf8] sm:$0xff]   ;;  %v1891_v1 = vld [vmem:[%s2379_s26 + $0x8] sm:$0xff]  }
 0x1d4   : > { %v1880_v51 = vld [vmem:[%s2357_s20 + $0x30] sm:$0xff]   ;;  %v1884_v55 = vld [vmem:[%s2357_s20 + $0x38] sm:$0xff]   ;;  %v1894_v4 = vld [vmem:[%s2379_s26 + $0x20] sm:$0xff]  }
 0x1d5   : > { %1651 = vmatpush3.bf16.msra.mxu0 %v1864_v35  ;;  %v1881_v52 = vld [vmem:[%s2357_s20 + $0xb0] sm:$0xff]   ;;  %v1885_v56 = vld [vmem:[%s2357_s20 + $0xb8] sm:$0xff]   ;;  %v1895_v5 = vld [vmem:[%s2379_s26 + $0x28] sm:$0xff]  }
 0x1d6   : > { %1673 = vmatpush3.bf16.msra.mxu1 %v1865_v36  ;;  %1652 = vmatprep.subr.bf16.mxu0 %v1866_v37  ;;  %v913_v57 = vld [vmem:[#allocation2] sm:$0xff]  ;;  %v914_v58 = vld [vmem:[#allocation2 + $0x8] sm:$0xff] }
 0x1d7   : > { %1674 = vmatprep.subr.bf16.mxu1 %v1867_v38  ;;  %v1593_v59 = vcombine.low %v913_v57, %v913_v57  ;;  %v1594_v60 = vcombine.high %v913_v57, %v913_v57  ;;  %v1595_v61 = vcombine.low %v914_v58, %v914_v58  ;;  %v1596_v62 = vcombine.high %v914_v58, %v914_v58  ;;  %v1892_v2 = vld [vmem:[%s2379_s26 + $0x10] sm:$0xff]   ;;  %v1893_v3 = vld [vmem:[%s2379_s26 + $0x18] sm:$0xff]   ;;  %v1592_v10 = vld [vmem:[%s462_s21] ss:$0 sm:$0xff] }
 0x1d8   : > { %v1896_v6 = vld [vmem:[%s2379_s26 + $0x30] sm:$0xff]   ;;  %v1897_v7 = vld [vmem:[%s2379_s26 + $0x38] sm:$0xff]  }
 0x1d9   : > { %1653 = vmatpush3.bf16.msra.mxu0 %v1868_v39  ;;  %1224 = vmatprep.mubr.bf16.mxu0 %v1594_v60 }
 0x1da   : > { %1675 = vmatpush3.bf16.msra.mxu1 %v1869_v40  ;;  %1654 = vmatprep.subr.bf16.mxu0 %v1870_v41  ;;  %v1629_v41 = vld [vmem:[%s465_s16] ss:$0 sm:$0xff]  ;;  %s2016_s16 = scalar_lea.vmem %s1426_s27, 128 }
 0x1db   : > { %1676 = vmatprep.subr.bf16.mxu1 %v1871_v42  ;;  %1264 = vmatprep.mubr.bf16.mxu1 %v1596_v62  ;;  %p2017_p8 = scmp.ne.s32.totalorder %s1426_s27, %s2016_s16  ;;  %p2024_p11 = scmp.lt.s32.totalorder %s2016_s16, %s2016_s16 }
 0x1dd   : > { %1655 = vmatpush3.bf16.msra.mxu0 %v1872_v43  ;;  %v1630_v43 = vld [vmem:[%s468_s25] ss:$0 sm:$0xff]  ;;  %p2018_p2 = pnand %p2017_p8, %p1754_p0  ;;  %p2025_p13 = por %p2024_p11, %p2023_p7 }
 0x1de   : > { %1677 = vmatpush3.bf16.msra.mxu1 %v1873_v44  ;;  %1656 = vmatprep.subr.bf16.mxu0 %v1874_v45 }
 0x1df   : > { %1678 = vmatprep.subr.bf16.mxu1 %v1875_v46  ;;  %p2019_p4 = pneg %p2018_p2 }
 0x1e1   : > { %1657 = vmatpush3.bf16.msra.mxu0 %v1876_v47  ;;  %v1310_v47 = vld [vmem:[#allocation10] sm:$0xff]  ;;  %p2026_p12 = pnand %p2025_p13, %p2019_p4 }
 0x1e2   : > { %1679 = vmatpush3.bf16.msra.mxu1 %v1877_v48  ;;  %1658 = vmatprep.subr.bf16.mxu0 %v1878_v49 }
 0x1e3   : > { %1680 = vmatprep.subr.bf16.mxu1 %v1879_v50 }
 0x1e5   : > { %1659 = vmatpush3.bf16.msra.mxu0 %v1880_v51 }
 0x1e6   : > { %1681 = vmatpush3.bf16.msra.mxu1 %v1881_v52  ;;  %1660 = vmatprep.subr.bf16.mxu0 %v1882_v53 }
 0x1e7   : > { %1682 = vmatprep.subr.bf16.mxu1 %v1883_v54 }
 0x1e9   : > { %1661 = vmatpush3.bf16.msra.mxu0 %v1884_v55 }
 0x1ea   : > { %1683 = vmatpush3.bf16.msra.mxu1 %v1885_v56  ;;  %1699 = vmatprep.subr.bf16.mxu0 %v2099_v0 }
 0x1ec   : > { %1225 = vmatmul.mubr.bf16.vlgmr.msra.gmra.mrb[0].mxu0 %v1593_v59 }
 0x1ed   : > { %1265 = vmatmul.mubr.bf16.vlgmr.msra.gmra.mrb[0].mxu1 %v1595_v61  ;;  %1700 = vmatpush3.bf16.msra.mxu0 %v1890_v63 }
 0x1ee   : > { %1701 = vmatprep.subr.bf16.mxu0 %v2099_v0  ;;  %1715 = vmatprep.mubr.msk.bf16.mxu0 %vm2100_vm0, %v2099_v0 }
 0x1f1   : > { %1702 = vmatpush3.bf16.msra.mxu0 %v1891_v1 }
 0x1f2   : > { %1703 = vmatprep.subr.bf16.mxu0 %v2099_v0 }
 0x1f5   : > { %1704 = vmatpush3.bf16.msra.mxu0 %v1892_v2 }
 0x1f6   : > { %1705 = vmatprep.subr.bf16.mxu0 %v2099_v0 }
 0x1f9   : > { %1706 = vmatpush3.bf16.msra.mxu0 %v1893_v3 }
 0x1fa   : > { %1707 = vmatprep.subr.bf16.mxu0 %v2099_v0 }
 0x1fd   : > { %1708 = vmatpush3.bf16.msra.mxu0 %v1894_v4 }
 0x1fe   : > { %1709 = vmatprep.subr.bf16.mxu0 %v2099_v0 }
 0x201   : > { %1710 = vmatpush3.bf16.msra.mxu0 %v1895_v5 }
 0x202   : > { %1711 = vmatprep.subr.bf16.mxu0 %v2099_v0 }
 0x205   : > { %1712 = vmatpush3.bf16.msra.mxu0 %v1896_v6 }
 0x206   : > { %1713 = vmatprep.subr.bf16.mxu0 %v2099_v0 }
 0x209   : > { %1714 = vmatpush3.bf16.msra.mxu0 %v1897_v7 }
 0x2bf   : > { %v1662_v8 = vpop.f32.mrb[0].mxu0 }
 0x2c0   : > { %v1684_v9 = vpop.f32.mrb[0].mxu1  ;;  %v1663_v11 = vpop.f32.mrb[1].mxu0 }
 0x2c1   : > { %v1685_v12 = vpop.f32.mrb[1].mxu1  ;;  %v1664_v13 = vadd.f32 %v1663_v11, %v1662_v8  ;;  %v1665_v19 = vpop.f32.mrb[2].mxu0 }
 0x2c2   : > { %v1686_v14 = vadd.f32 %v1685_v12, %v1684_v9  ;;  %v1687_v20 = vpop.f32.mrb[2].mxu1  ;;  %v1666_v21 = vpop.f32.mrb[3].mxu0 }
 0x2c3   : > { %v1688_v22 = vpop.f32.mrb[3].mxu1  ;;  %v1227_v23 = vadd.f32 %v1664_v13, %v1592_v10 }
 0x2c5   : > { %v1267_v24 = vadd.f32 %v1686_v14, %v1227_v23 }
 0x2c7   : > { %v1272_v15 = vmul.f32 0.01, %v1267_v24 }
 0x2c9   : > { %v1273_v25 = vmax.f32 %v1267_v24, %v1272_v15 }
 0x2cb   : > { %v1276_v26 = vrot.slane %v1273_v25, 4 }
 0x2cd   : > { %v1277_v27 = vadd.f32 %v1276_v26, %v1273_v25 }
 0x2cf   : > { %v1278_v16 = vrot.slane %v1277_v27, 2 }
 0x2d1   : > { %v1279_v17 = vadd.f32 %v1278_v16, %v1277_v27 }
 0x2d3   : > { %v1280_v18 = vrot.slane %v1279_v17, 1 }
 0x2d5   : > { %v1281_v28 = vadd.f32 %v1280_v18, %v1279_v17 }
 0x2d7   : > { %v1283_v29 = vmul.f32 0.125, %v1281_v28 }
 0x2d9   : > { %v1284_v30 = vsub.f32 %v1273_v25, %v1283_v29 }
 0x2db   : > { %v1285_v31 = vmul.f32 %v1284_v30, %v1284_v30 }
 0x2dd   : > { %v1286_v32 = vrot.slane %v1285_v31, 4 }
 0x2df   : > { %v1287_v33 = vadd.f32 %v1286_v32, %v1285_v31 }
 0x2e1   : > { %v1288_v34 = vrot.slane %v1287_v33, 2 }
 0x2e3   : > { %v1289_v35 = vadd.f32 %v1288_v34, %v1287_v33 }
 0x2e5   : > { %v1290_v36 = vrot.slane %v1289_v35, 1 }
 0x2e7   : > { %v1291_v37 = vadd.f32 %v1290_v36, %v1289_v35 }
 0x2e9   : > { %v1292_v38 = vmul.f32 0.125, %v1291_v37 }
 0x2eb   : > { %v1293_v39 = vadd.f32 1e-05, %v1292_v38 }
 0x2ed   : > { %1898 = vrsqrt.f32 %v1293_v39 }
 0x2f7   : > { %v1899_v40 = vpop.eup %1898 }
 0x2f8   : > { %v1295_v42 = vmul.f32 %v1899_v40, %v1284_v30 }
 0x2fa   : > { %v1302_v44 = vmul.f32 %v1629_v41, %v1295_v42 }
 0x2fc   : > { %v1309_v45 = vadd.f32 %v1630_v43, %v1302_v44 }
 0x2fe   : > { %v1311_v46 = vpack.c.bf16 %v1309_v45, %v1309_v45 }
 0x300   : > { %1716 = vmatmul.mubr.bf16.vlgmr.msra.gmra.mrb[4].mxu0 %v1311_v46 }
 0x3d3   : > { %v1410_v48 = vpop.f32.mrb[4].mxu0 }
 0x3d4   : > { %v1416_v49 = vadd.f32 %v1410_v48, %v1310_v47  ;;  %v1717_v50 = vpop.f32.mrb[5].mxu0 }
 0x3d5   : > { %v1413_v51 = vpop.f32.mrb[6].mxu0 }
 0x3d6   : > { %1417 = vst [vmem:[#allocation10] sm:$0xff] %v1416_v49  ;;  %v1718_v52 = vpop.f32.mrb[7].mxu0 }
 0x3d7   : > { %2029 = shalt.err (!%p2026_p12)
}
 0x3d8   : > { %s2545_s23 = sld [smem:[#allocation21_spill]] }
 0x3de   : > { %s2030_s25 = scalar_lea.hbm %s2545_s23, 128 }
 0x3df   : > { %p2031_p5 = scmp.ne.s32.totalorder %s2545_s23, %s2030_s25  ;;  %p2036_p9 = scmp.lt.u32.totalorder %s2030_s25, %s2545_s23 }
 0x3e1   : > { %p2032_p10 = pnand %p2031_p5, %p1754_p0 }
 0x3e3   : > { %p2033_p1 = pneg %p2032_p10 }
 0x3e5   : > { %p2038_p3 = pnand %p2036_p9, %p2033_p1 }
 0x3e7   : > { %2041 = shalt.err (!%p2038_p3)
}
 0x3e8   : > { %1732 = dma.vmem_to_hbm [thread:$0]  (%p1754_p0), %s1426_s27, 128, %s2545_s23, [#allocation5]  }
 0x3e9   : > { %2071 = dma.done.wait (%p1754_p0), [#allocation5], 128  }
 0x3ea   : > { %2073 = vsyncadd (%p1754_p0), [#allocation5], 4294967168 }
 0x3eb PF: > { %s2546_s16 = sld [smem:[#allocation15_spill]]  ;;  %s2547_s29 = sld [smem:[#allocation16_spill]] }
 0x3ec   : > { %s2548_s13 = smov %s2080_s14  ;;  %s2549_s14 = smov %s2084_s15 }
 0x3f1   : > { %p20_p6 = scmp.ge.s32.totalorder %s2546_s16, 6   ;;  %s2550_s15 = smov %s2547_s29 }
 0x3f3   :  { %22 = sbr.rel (!%p20_p6) target bundleno = 10 (0xa), region = 128 }
 0x3fa   :  { %1438 = vsyncpa [#allocation4], 1 }
 0x3fb   :  { %1440 = vsyncpa [#allocation4 + $0x1], 1 }
 0x3fc   :  { %1441 = vsyncpa [#allocation7], 1 }
 0x3fd   :  { %1442 = vsyncpa [#allocation5], 1 }
 0x3fe   :  { %1444 = vsyncpa [#allocation5 + $0x1], 1 }

</bundles_post_ra>
